<compile_context>
chip_gen: v6e
topology: v6e:2x2x1
jax: 0.10.0
libtpu: 0.0.40
codegen_flags: <defaults>
</compile_context>

<pallas_src>
import jax
import jax.numpy as jnp
import numpy as np
from jax.experimental import pallas as pl
from jax.experimental.pallas import tpu as pltpu

_LANES = 128
_ACC_SUBLANES = 8                      # one f32 vreg worth of sublanes per accumulator
_ALIGN = _ACC_SUBLANES * _LANES        # 1024: per-sample alignment for the free 3-D view
_TARGET_BYTES = 2 * 1024 * 1024        # ~2 MiB of combined (x + t) bytes per grid step
_MAX_SUB = 2048                        # cap: f32 intermediates stay ~1 MiB each (v7x safe)


def _cdiv(a: int, b: int) -> int:
    return -(-a // b)


def _sublane_granularity(dtype) -> int:
    """Native packed sublane tile height for a dtype (f32:8, bf16:16, int8:32)."""
    itemsize = jnp.dtype(dtype).itemsize
    return max(_ACC_SUBLANES, 32 // max(1, itemsize))


def _make_soft_dice_kernel(r_rows: int, sub: int, kt: int, mask_tail: bool):
    """Build the kernel for a fixed (static) tiling.

    Refs per grid step (b, k):
      x_ref / t_ref : (Bt, SUB, 128) tiles in their native dtypes.
      num_ref / den_ref : (Bt, 8, 128) f32 per-sample accumulators, output-
      resident across the k axis (written back to HBM only when b changes).
    """

    def kernel(x_ref, t_ref, num_ref, den_ref):
        k = pl.program_id(1)

        @pl.when(k == 0)
        def _init():
            num_ref[...] = jnp.zeros_like(num_ref)
            den_ref[...] = jnp.zeros_like(den_ref)

        # Cast the narrow tiles to f32 on-chip; products and sums stay in f32.
        x = x_ref[...].astype(jnp.float32)
        t = t_ref[...].astype(jnp.float32)

        def _accumulate(xv, tv):
            p = xv * tv              # numerator partials
            q = xv * xv + tv * tv    # denominator partials (fused)
            bt = xv.shape[0]
            # Collapse only the vreg-aligned sublane groups (pure VPU adds);
            # the cross-lane XLU reduce is deferred to the wrapper epilogue.
            num_ref[...] += p.reshape(
                bt, sub // _ACC_SUBLANES, _ACC_SUBLANES, _LANES).sum(axis=1)
            den_ref[...] += q.reshape(
                bt, sub // _ACC_SUBLANES, _ACC_SUBLANES, _LANES).sum(axis=1)

        if not mask_tail:
            _accumulate(x, t)
        else:
            # Only the last reduction tile is ragged; mask-free fast path for
            # all other tiles.
            tail_rows = r_rows - (kt - 1) * sub   # valid sublane rows in last tile

            @pl.when(k < kt - 1)
            def _full():
                _accumulate(x, t)

            @pl.when(k == kt - 1)
            def _tail():
                # Rows past the end of the sample hold Pallas OOB garbage:
                # zero-mask BOTH contributions (num and den) before accumulating.
                row = jax.lax.broadcasted_iota(jnp.int32, x.shape, dimension=1)
                valid = row < tail_rows
                _accumulate(jnp.where(valid, x, 0.0), jnp.where(valid, t, 0.0))

    return kernel


def soft_dice_loss(inputs, target, eps=1e-8):
    """Pallas implementation of SoftDiceLoss.forward (batch-mean soft dice)."""
    x = inputs
    t = target
    if t.dtype == jnp.bool_:
        # Narrow 1-byte dtype for the DMA path (pred-typed refs not relied on).
        t = t.astype(jnp.int8)

    n = x.shape[0]
    d = int(np.prod(x.shape[1:]))

    # target.view(input.size()): both tensors are flattened per-sample, which
    # is equivalent as long as the total element counts match.
    xf = x.reshape(n, d)
    tf = t.reshape(n, d)

    # (n, r, 128) view is free when d is a multiple of 1024 (typical for C*H*W).
    # Otherwise pad with zeros (sum-neutral) to the next 1024 multiple.
    # TODO(synk): remove this rare pad pass via lane-level tail masking on 2-D blocks.
    d_al = ((d + _ALIGN - 1) // _ALIGN) * _ALIGN
    if d_al != d:
        xf = jnp.pad(xf, ((0, 0), (0, d_al - d)))
        tf = jnp.pad(tf, ((0, 0), (0, d_al - d)))
    r = d_al // _LANES                 # sublane rows per sample; multiple of 8

    xr = xf.reshape(n, r, _LANES)
    tr = tf.reshape(n, r, _LANES)

    # ---- static tiling selection -------------------------------------------
    bytes_per_row = _LANES * (jnp.dtype(x.dtype).itemsize +
                              jnp.dtype(t.dtype).itemsize)
    gran = max(_sublane_granularity(x.dtype), _sublane_granularity(t.dtype))
    rows_budget = min(_MAX_SUB, max(gran, _TARGET_BYTES // bytes_per_row))

    if r <= rows_budget:
        # Whole sample fits one tile: pack several samples per grid step.
        sub = r
        kt = 1
        batch_cap = max(1, _cdiv(n, 2))            # keep >=2 parallel steps (v7x)
        bt = int(min(n, batch_cap, max(1, rows_budget // r)))
    else:
        # Large sample: tile the reduction dim; ragged tail handled in-kernel.
        bt = 1
        sub = max(gran, (rows_budget // gran) * gran)
        kt = _cdiv(r, sub)
    mask_tail = (kt * sub != r)

    grid = (_cdiv(n, bt), kt)

    num, den = pl.pallas_call(
        _make_soft_dice_kernel(r, sub, kt, mask_tail),
        out_shape=(
            jax.ShapeDtypeStruct((n, _ACC_SUBLANES, _LANES), jnp.float32),
            jax.ShapeDtypeStruct((n, _ACC_SUBLANES, _LANES), jnp.float32),
        ),
        grid=grid,
        in_specs=[
            pl.BlockSpec((bt, sub, _LANES), lambda b, k: (b, k, 0)),
            pl.BlockSpec((bt, sub, _LANES), lambda b, k: (b, k, 0)),
        ],
        out_specs=(
            pl.BlockSpec((bt, _ACC_SUBLANES, _LANES), lambda b, k: (b, 0, 0)),
            pl.BlockSpec((bt, _ACC_SUBLANES, _LANES), lambda b, k: (b, 0, 0)),
        ),
        compiler_params=pltpu.CompilerParams(
            dimension_semantics=("parallel", "arbitrary"),
        ),
    )(xr, tr)

    # Tiny epilogue: final cross-lane reduce, eps-divide and batch mean.
    numerator = 2.0 * jnp.sum(num, axis=(1, 2))
    denominator = jnp.sum(den, axis=(1, 2))
    return jnp.mean(1.0 - numerator / (denominator + float(eps)))


def _soft_dice_loss_ref(inputs, target, eps=1e-8):
    x = inputs.astype(jnp.float32)
    t = target.astype(jnp.float32).reshape(x.shape)
    axes = tuple(range(1, x.ndim))
    numerator = 2.0 * jnp.sum(x * t, axis=axes)
    denominator = jnp.sum(x ** 2 + t ** 2, axis=axes)
    return jnp.mean(1.0 - numerator / (denominator + eps))


if __name__ == "__main__":
    key = jax.random.PRNGKey(0)
    k1, k2, k3, k4 = jax.random.split(key, 4)

    shape = (2, 4, 16, 16)  # NCHW, small test shapes

    # Case 1: float32 predictions, int32 targets (original module dtypes).
    x32 = jax.nn.sigmoid(jax.random.normal(k1, shape, dtype=jnp.float32))
    t32 = jax.random.bernoulli(k2, p=0.5, shape=shape).astype(jnp.int32)
    loss32 = jax.block_until_ready(soft_dice_loss(x32, t32))
    ref32 = _soft_dice_loss_ref(x32, t32)
    np.testing.assert_allclose(np.asarray(loss32), np.asarray(ref32),
                               rtol=1e-5, atol=1e-6)

    # Case 2: bf16 predictions, bool targets (narrow-dtype fast path).
    xbf = jax.nn.sigmoid(
        jax.random.normal(k3, shape, dtype=jnp.float32)).astype(jnp.bfloat16)
    tb = jax.random.bernoulli(k4, p=0.5, shape=shape)
    lossbf = jax.block_until_ready(soft_dice_loss(xbf, tb))
    refbf = _soft_dice_loss_ref(xbf, tb)
    np.testing.assert_allclose(np.asarray(lossbf), np.asarray(refbf),
                               rtol=1e-5, atol=1e-6)

    print("KERNEL_OK")
</pallas_src>

<mosaic_0001>
module attributes {stable_mosaic.version = 11 : i64} {
  func.func @kernel(%arg0: i32, %arg1: i32, %arg2: memref<1x8x128xf32, #tpu.memory_space<vmem>>, %arg3: memref<1x8x128xi32, #tpu.memory_space<vmem>>, %arg4: memref<1x8x128xf32, #tpu.memory_space<vmem>>, %arg5: memref<1x8x128xf32, #tpu.memory_space<vmem>>) attributes {dimension_semantics = [#tpu.dimension_semantics<parallel>, #tpu.dimension_semantics<arbitrary>], iteration_bounds = array<i64: 2, 1>, scalar_prefetch = 0 : i64, scratch_operands = 0 : i64, tpu.core_type = #tpu.core_type<tc>, window_params = [{transform_indices = @transform_0, window_bounds = array<i64: 1, 8, 128>}, {transform_indices = @transform_1, window_bounds = array<i64: 1, 8, 128>}, {transform_indices = @transform_2, window_bounds = array<i64: 1, 8, 128>}, {transform_indices = @transform_3, window_bounds = array<i64: 1, 8, 128>}]} {
    %c0_i32 = arith.constant 0 : i32
    %0 = arith.cmpi eq, %arg1, %c0_i32 : i32
    %1 = arith.extui %0 : i1 to i32
    %c0_i32_0 = arith.constant 0 : i32
    %2 = arith.cmpi ne, %1, %c0_i32_0 : i32
    scf.if %2 {
      %cst_19 = arith.constant 0.000000e+00 : f32
      %20 = vector.broadcast %cst_19 : f32 to vector<1x8x128xf32>
      %c0_20 = arith.constant 0 : index
      %c0_21 = arith.constant 0 : index
      %c0_22 = arith.constant 0 : index
      %21 = vector.load %arg4[%c0_20, %c0_21, %c0_22] : memref<1x8x128xf32, #tpu.memory_space<vmem>>, vector<1x8x128xf32>
      tpu.vector_store %arg4[%c0_20, %c0_21, %c0_22], %20 {strides = array<i32>} : memref<1x8x128xf32, #tpu.memory_space<vmem>>, vector<1x8x128xf32>,
      %cst_23 = arith.constant 0.000000e+00 : f32
      %22 = vector.broadcast %cst_23 : f32 to vector<1x8x128xf32>
      %c0_24 = arith.constant 0 : index
      %c0_25 = arith.constant 0 : index
      %c0_26 = arith.constant 0 : index
      %23 = vector.load %arg5[%c0_24, %c0_25, %c0_26] : memref<1x8x128xf32, #tpu.memory_space<vmem>>, vector<1x8x128xf32>
      tpu.vector_store %arg5[%c0_24, %c0_25, %c0_26], %22 {strides = array<i32>} : memref<1x8x128xf32, #tpu.memory_space<vmem>>, vector<1x8x128xf32>,
    } else {
    }
    %c0 = arith.constant 0 : index
    %c0_1 = arith.constant 0 : index
    %c0_2 = arith.constant 0 : index
    %3 = vector.load %arg2[%c0, %c0_1, %c0_2] : memref<1x8x128xf32, #tpu.memory_space<vmem>>, vector<1x8x128xf32>
    %c0_3 = arith.constant 0 : index
    %c0_4 = arith.constant 0 : index
    %c0_5 = arith.constant 0 : index
    %4 = vector.load %arg3[%c0_3, %c0_4, %c0_5] : memref<1x8x128xi32, #tpu.memory_space<vmem>>, vector<1x8x128xi32>
    %5 = arith.sitofp %4 : vector<1x8x128xi32> to vector<1x8x128xf32>
    %6 = arith.mulf %3, %5 : vector<1x8x128xf32>
    %7 = arith.mulf %3, %3 : vector<1x8x128xf32>
    %8 = arith.mulf %5, %5 : vector<1x8x128xf32>
    %9 = arith.addf %7, %8 : vector<1x8x128xf32>
    %c0_6 = arith.constant 0 : index
    %c0_7 = arith.constant 0 : index
    %c0_8 = arith.constant 0 : index
    %10 = vector.load %arg4[%c0_6, %c0_7, %c0_8] : memref<1x8x128xf32, #tpu.memory_space<vmem>>, vector<1x8x128xf32>
    %11 = vector.shape_cast %6 : vector<1x8x128xf32> to vector<1x1x8x128xf32>
    %cst = arith.constant dense<0.000000e+00> : vector<1x8x128xf32>
    %12 = vector.multi_reduction <add>, %11, %cst [1] : vector<1x1x8x128xf32> to vector<1x8x128xf32>
    %13 = arith.addf %10, %12 : vector<1x8x128xf32>
    %c0_9 = arith.constant 0 : index
    %c0_10 = arith.constant 0 : index
    %c0_11 = arith.constant 0 : index
    %14 = vector.load %arg4[%c0_9, %c0_10, %c0_11] : memref<1x8x128xf32, #tpu.memory_space<vmem>>, vector<1x8x128xf32>
    tpu.vector_store %arg4[%c0_9, %c0_10, %c0_11], %13 {strides = array<i32>} : memref<1x8x128xf32, #tpu.memory_space<vmem>>, vector<1x8x128xf32>,
    %c0_12 = arith.constant 0 : index
    %c0_13 = arith.constant 0 : index
    %c0_14 = arith.constant 0 : index
    %15 = vector.load %arg5[%c0_12, %c0_13, %c0_14] : memref<1x8x128xf32, #tpu.memory_space<vmem>>, vector<1x8x128xf32>
    %16 = vector.shape_cast %9 : vector<1x8x128xf32> to vector<1x1x8x128xf32>
    %cst_15 = arith.constant dense<0.000000e+00> : vector<1x8x128xf32>
    %17 = vector.multi_reduction <add>, %16, %cst_15 [1] : vector<1x1x8x128xf32> to vector<1x8x128xf32>
    %18 = arith.addf %15, %17 : vector<1x8x128xf32>
    %c0_16 = arith.constant 0 : index
    %c0_17 = arith.constant 0 : index
    %c0_18 = arith.constant 0 : index
    %19 = vector.load %arg5[%c0_16, %c0_17, %c0_18] : memref<1x8x128xf32, #tpu.memory_space<vmem>>, vector<1x8x128xf32>
    tpu.vector_store %arg5[%c0_16, %c0_17, %c0_18], %18 {strides = array<i32>} : memref<1x8x128xf32, #tpu.memory_space<vmem>>, vector<1x8x128xf32>,
    return
  }
  func.func @transform_0(%arg0: i32, %arg1: i32) -> (i32, i32, i32) {
    %c0_i32 = arith.constant 0 : i32
    %c0_i32_0 = arith.constant 0 : i32
    return %arg0, %arg1, %c0_i32 : i32, i32, i32
  }
  func.func @transform_1(%arg0: i32, %arg1: i32) -> (i32, i32, i32) {
    %c0_i32 = arith.constant 0 : i32
    %c0_i32_0 = arith.constant 0 : i32
    return %arg0, %arg1, %c0_i32 : i32, i32, i32
  }
  func.func @transform_2(%arg0: i32, %arg1: i32) -> (i32, i32, i32) {
    %c0_i32 = arith.constant 0 : i32
    %c0_i32_0 = arith.constant 0 : i32
    %c0_i32_1 = arith.constant 0 : i32
    return %arg0, %c0_i32, %c0_i32_0 : i32, i32, i32
  }
  func.func @transform_3(%arg0: i32, %arg1: i32) -> (i32, i32, i32) {
    %c0_i32 = arith.constant 0 : i32
    %c0_i32_0 = arith.constant 0 : i32
    %c0_i32_1 = arith.constant 0 : i32
    return %arg0, %c0_i32, %c0_i32_0 : i32, i32, i32
  }
}

</mosaic_0001>

<bundles_post_ra>
// kernel: tpu_custom_call.1
= control target key start
LH: loop header
LB: loop body
LE: loop exit
PB: predicated region body
PF: predicated region fallthrough
CT: control target
= control target key end

     0   :  { %9 = vsyncpa [#allocation3], 0  ;;  %s939_s0 = inlined_call_operand.hbm [shape: f32[2,8,128], index: 0, kind: input, shape index: {}]   ;;  %s940_s1 = inlined_call_operand.hbm [shape: s32[2,8,128], index: 1, kind: input, shape index: {}]   ;;  %s941_s2 = inlined_call_operand.hbm [shape: f32[2,8,128], index: 2, kind: output, shape index: {0}]   ;;  %s942_s3 = inlined_call_operand.hbm [shape: f32[2,8,128], index: 3, kind: output, shape index: {1}]  }
   0x1   :  { %11 = vsyncpa [#allocation3 + $0x1], 0 }
   0x2   :  { %12 = vsyncpa [#allocation6], 0 }
   0x3   :  { %14 = vsyncpa [#allocation6 + $0x1], 0 }
   0x4   :  { %15 = vsyncpa [#allocation4], 0 }
   0x5   :  { %17 = vsyncpa [#allocation4 + $0x1], 0 }
   0x6   :  { %18 = vsyncpa [#allocation9], 0 }
   0x7   :  { %20 = vsyncpa [#allocation9 + $0x1], 0  ;;  %s728_s12 = smov 0   ;;  %s730_s13 = smov 0  }
   0x8   :  { %s732_s14 = smov 0   ;;  %s734_s15 = smov 0  }
   0x9   :  { %s736_s16 = smov 0   ;;  %s738_s17 = smov 0  }
   0xa LB: > { %s440_s18 = sadd.s32 4294967295, %s702_s17   ;;  %s441_s19 = sadd.s32 4294967294, %s702_s17   ;;  %s702_s17 = sphi %s738_s17, %s26_s17   ;;  %s698_s16 = sphi %s736_s16, %s954_s16   ;;  %s694_s15 = sphi %s734_s15, %s953_s15   ;;  %s690_s14 = sphi %s732_s14, %s952_s14   ;;  %s686_s13 = sphi %s730_s13, %s951_s13   ;;  %s682_s12 = sphi %s728_s12, %s950_s12  }
   0xb   : > { %s38_s20 = sadd.s32 1, %s698_s16  ;;  %s47_s21 = sadd.s32 1, %s690_s14 }
   0xc   : > { %p40_p0 = scmp.ge.s32.totalorder %s38_s20, 2  ;;  %p54_p1 = scmp.ne.s32.totalorder %s690_s14, %s686_s13 }
   0xd   : > { %p55_p2 = scmp.eq.s32.totalorder %s702_s17, 0  ;;  %p60_p3 = scmp.ne.s32.totalorder %s686_s13, %s682_s12 }
   0xe   : > { %s956_s20 = smov (%p40_p0, %s38_s20), 0  ;;  %p61_p5 = scmp.eq.s32.totalorder %s440_s18, 0 }
   0xf   : > { %p769_p4 = por %p55_p2, %p54_p1  ;;  %s42_s23 = ssub.s32 %s698_s16, %s956_s20 }
  0x10   : > { %p112_p6 = scmp.eq.s32.totalorder %s440_s18, 1  ;;  %p45_p7 = scmp.eq.s32.totalorder %s42_s23, 0 }
  0x11   : > { %p775_p8 = por %p61_p5, %p60_p3  ;;  %p118_p10 = scmp.eq.s32.totalorder %s441_s19, 1 }
  0x12   : > { %p779_p9 = por %p112_p6, %p54_p1  ;;  %p481_p13 = scmp.lt.s32.totalorder %s702_s17, 2 }
  0x13   : > { %s784_s26 = scalar_select %p45_p7, %s690_s14, %s47_s21  }
  0x14   : > { %p786_p11 = por %p118_p10, %p60_p3  ;;  %s793_s28 = sand.u32 1, %s690_s14  }
  0x15   : > { %s444_s29 = sshll.u32 %s793_s28, 3  ;;  %s445_s30 = sshll.u32 %s698_s16, 7 }
  0x16   : > { %s174_s6 = scalar_lea.hbm %s939_s0, %s445_s30  ;;  %s168_s7 = scalar_lea.vmem [#allocation2], %s444_s29 }
  0x17   : > { %s176_s8 = sshll.u32 %s168_s7, 4  ;;  %p802_p0 = pnand %p481_p13, %p769_p4  ;;  %s177_s8 = int_to_ptr.vmem [resolvable:$true] %s176_s8 }
  0x18   : > { %p448_p1 = scmp.ge.s32.totalorder %s702_s17, 1  ;;  %p200_p2 = scmp.lt.s32.totalorder %s702_s17, 3 }
  0x19   : > { %s165_s10 = scalar_lea.sflag [#allocation3], %s793_s28  ;;  %p534_p3 = pneg %p802_p0 }
  0x1a   : > { %s545_s11 = scalar_lea.vmem %s177_s8, 128  ;;  %s704_s18 = smov [#allocation2]  }
  0x1b   : > { %p546_p5 = scmp.ne.s32.totalorder %s177_s8, %s545_s11  ;;  %s550_s19 = sshll.u32 %s704_s18, 4  ;;  %s551_s19 = int_to_ptr.vmem [resolvable:$false] %s550_s19 }
  0x1c   : > { %s552_s21 = scalar_lea.vmem %s551_s19, 256  ;;  %p553_p4 = scmp.lt.s32.totalorder %s177_s8, %s551_s19 }
  0x1d   : > { %p548_p6 = pnand %p546_p5, %p534_p3  ;;  %p554_p10 = scmp.lt.s32.totalorder %s552_s21, %s545_s11 }
  0x1f   : > { %p549_p7 = pneg %p548_p6  ;;  %p555_p13 = por %p554_p10, %p553_p4 }
  0x21   : > { %p556_p12 = pnand %p555_p13, %p549_p7 }
  0x23   : > { %559 = shalt.err (!%p556_p12)
}
  0x24   : > { %470 = dma.hbm_to_vmem [thread:$0]  (!%p802_p0), %s174_s6, 128, %s177_s8, %s165_s10  }
  0x25   : > { %p820_p5 = pnand %p448_p1, %p200_p2  ;;  %s193_s5 = scalar_lea.hbm %s940_s1, %s445_s30 }
  0x26   : > { %s187_s7 = scalar_lea.vmem [#allocation5], %s444_s29  ;;  %s184_s18 = scalar_lea.sflag [#allocation6], %s793_s28 }
  0x27   : > { %s195_s11 = sshll.u32 %s187_s7, 4  ;;  %s705_s6 = smov [#allocation5]   ;;  %s196_s11 = int_to_ptr.vmem [resolvable:$true] %s195_s11 }
  0x28   : > { %s573_s19 = scalar_lea.vmem %s196_s11, 128  ;;  %s578_s8 = sshll.u32 %s705_s6, 4  ;;  %s579_s8 = int_to_ptr.vmem [resolvable:$false] %s578_s8 }
  0x29   : > { %p574_p12 = scmp.ne.s32.totalorder %s196_s11, %s573_s19  ;;  %s580_s10 = scalar_lea.vmem %s579_s8, 256 }
  0x2a   : > { %p581_p1 = scmp.lt.s32.totalorder %s196_s11, %s579_s8  ;;  %p582_p2 = scmp.lt.s32.totalorder %s580_s10, %s573_s19 }
  0x2b   : > { %p576_p6 = pnand %p574_p12, %p534_p3 }
  0x2c   : > { %p583_p4 = por %p582_p2, %p581_p1 }
  0x2d   : > { %p577_p7 = pneg %p576_p6 }
  0x2f   : > { %p584_p10 = pnand %p583_p4, %p577_p7 }
  0x31   : > { %587 = shalt.err (!%p584_p10)
}
  0x32   : > { %473 = dma.hbm_to_vmem [thread:$0]  (!%p802_p0), %s193_s5, 128, %s196_s11, %s184_s18  }
  0x33   : > { %204 = sbr.rel (%p820_p5) target bundleno = 106 (0x6a), region = 28  ;;  %s836_s28 = sand.u32 (!%p820_p5), 1, %s686_s13  }
  0x34   : > { %s839_s29 = sshll.u32 (!%p820_p5), %s836_s28, 3  ;;  %s207_s30 = scalar_lea.sflag (!%p820_p5), [#allocation3], %s836_s28 }
  0x35   : > { %s210_s21 = scalar_lea.vmem (!%p820_p5), [#allocation2], %s839_s29 }
  0x38   : > { %665 = dma.done.wait (%p775_p8), %s207_s30, 128  }
  0x39   : > { %667 = vsyncadd (%p775_p8), %s207_s30, 4294967168  ;;  %s216_s9 = scalar_lea.sflag [#allocation6], %s836_s28  ;;  %s219_s22 = scalar_lea.vmem [#allocation5], %s839_s29 }
  0x3a   : > { %669 = dma.done.wait (%p775_p8), %s216_s9, 128  }
  0x3b   : > { %671 = vsyncadd (%p775_p8), %s216_s9, 4294967168  ;;  %v258_v0 = vld [vmem:[%s210_s21] sm:$0xff]  ;;  %v259_v1 = vld [vmem:[%s219_s22] sm:$0xff]  ;;  %s455_s23 = sshll.u32 %s694_s15, 7  ;;  %s244_s4 = scalar_lea.vmem [#allocation7], %s839_s29 }
  0x3c   : > { %v260_v2 = vcvt.s32.f32 %v259_v1  ;;  %v262_v3 = vmul.f32 %v258_v0, %v258_v0  ;;  %s292_s5 = sshll.u32 %s244_s4, 4  ;;  %s251_s7 = scalar_lea.vmem [#allocation8], %s839_s29  ;;  %s863_s5 = int_to_ptr.vmem [resolvable:$true] %s292_s5 }
  0x3d   : > { %s305_s11 = sshll.u32 %s251_s7, 4  ;;  %s861_s19 = scalar_lea.hbm %s941_s2, %s455_s23  ;;  %s870_s11 = int_to_ptr.vmem [resolvable:$true] %s305_s11 }
  0x3e   : > { %v261_v4 = vmul.f32 %v260_v2, %v258_v0  ;;  %v263_v5 = vmul.f32 %v260_v2, %v260_v2  ;;  %s868_s8 = scalar_lea.hbm %s942_s3, %s455_s23  ;;  %s274_s10 = scalar_lea.sflag [#allocation4], %s836_s28 }
  0x3f   : > { %s588_s30 = scalar_lea.vmem %s863_s5, 128  ;;  %s706_s21 = smov [#allocation7]  }
  0x40   : > { %v264_v6 = vadd.f32 %v263_v5, %v262_v3  ;;  %268 = vst [vmem:[%s244_s4] sm:$0xff] %v261_v4  ;;  %p589_p8 = scmp.ne.s32.totalorder %s863_s5, %s588_s30  ;;  %s592_s9 = sshll.u32 %s706_s21, 4  ;;  %s593_s9 = int_to_ptr.vmem [resolvable:$false] %s592_s9 }
  0x41   : > { %s594_s22 = scalar_lea.vmem %s593_s9, 256  ;;  %p595_p13 = scmp.lt.s32.totalorder %s863_s5, %s593_s9 }
  0x42   : > { %p590_p0 = pnand %p589_p8, %p779_p9  ;;  %p596_p5 = scmp.lt.s32.totalorder %s594_s22, %s588_s30 }
  0x44   : > { %p591_p3 = pneg %p590_p0  ;;  %p597_p12 = por %p596_p5, %p595_p13 }
  0x46   : > { %p598_p6 = pnand %p597_p12, %p591_p3 }
  0x48   : > { %601 = shalt.err (!%p598_p6)
}
  0x49   : > { %s602_s23 = scalar_lea.hbm %s861_s19, 128  ;;  %s606_s18 = scalar_lea.hbm %s941_s2, 256 }
  0x4a   : > { %p603_p7 = scmp.ne.s32.totalorder %s861_s19, %s602_s23  ;;  %p607_p4 = scmp.lt.s32.totalorder %s861_s19, %s941_s2 }
  0x4b   : > { %p608_p10 = scmp.lt.s32.totalorder %s606_s18, %s602_s23 }
  0x4c   : > { %p604_p1 = pnand %p603_p7, %p779_p9 }
  0x4d   : > { %p609_p8 = por %p608_p10, %p607_p4 }
  0x4e   : > { %p605_p2 = pneg %p604_p1 }
  0x50   : > { %p610_p0 = pnand %p609_p8, %p605_p2 }
  0x52   : > { %613 = shalt.err (!%p610_p0)
}
  0x53   : > { %463 = dma.vmem_to_hbm [thread:$0]  (%p779_p9), %s863_s5, 128, %s861_s19, %s274_s10   ;;  %272 = vst [vmem:[%s251_s7] sm:$0xff] %v264_v6 }
  0x54   : > { %s279_s30 = scalar_lea.sflag [#allocation9], %s836_s28  ;;  %s614_s21 = scalar_lea.vmem %s870_s11, 128 }
  0x55   : > { %p615_p3 = scmp.ne.s32.totalorder %s870_s11, %s614_s21  ;;  %s707_s9 = smov [#allocation8]  }
  0x56   : > { %s618_s22 = sshll.u32 %s707_s9, 4  ;;  %s619_s22 = int_to_ptr.vmem [resolvable:$false] %s618_s22 }
  0x57   : > { %p616_p13 = pnand %p615_p3, %p779_p9  ;;  %s620_s23 = scalar_lea.vmem %s619_s22, 256 }
  0x58   : > { %p621_p12 = scmp.lt.s32.totalorder %s870_s11, %s619_s22  ;;  %p622_p6 = scmp.lt.s32.totalorder %s620_s23, %s614_s21 }
  0x59   : > { %p617_p5 = pneg %p616_p13 }
  0x5a   : > { %p623_p7 = por %p622_p6, %p621_p12 }
  0x5c   : > { %p624_p1 = pnand %p623_p7, %p617_p5 }
  0x5e   : > { %627 = shalt.err (!%p624_p1)
}
  0x5f   : > { %s628_s29 = scalar_lea.hbm %s868_s8, 128  ;;  %s632_s7 = scalar_lea.hbm %s942_s3, 256 }
  0x60   : > { %p629_p2 = scmp.ne.s32.totalorder %s868_s8, %s628_s29  ;;  %p633_p8 = scmp.lt.s32.totalorder %s868_s8, %s942_s3 }
  0x61   : > { %p634_p0 = scmp.lt.s32.totalorder %s632_s7, %s628_s29 }
  0x62   : > { %p630_p4 = pnand %p629_p2, %p779_p9 }
  0x63   : > { %p635_p3 = por %p634_p0, %p633_p8 }
  0x64   : > { %p631_p10 = pneg %p630_p4 }
  0x66   : > { %p636_p13 = pnand %p635_p3, %p631_p10 }
  0x68   : > { %639 = shalt.err (!%p636_p13)
}
  0x69   : > { %464 = dma.vmem_to_hbm [thread:$0]  (%p779_p9), %s870_s11, 128, %s868_s8, %s279_s30  }
  0x6a PF: > { %s317_s4 = sand.u32 1, %s682_s12   ;;  %p949_p5 = scmp.ge.s32.totalorder %s702_s17, 2 }
  0x6b   : > { %s318_s24 = scalar_lea.sflag [#allocation4], %s317_s4 }
  0x6c   : > { %p475_p12 = pnand %p949_p5, %p786_p11 }
  0x6e   : > { %p476_p6 = pneg %p475_p12 }
  0x70   : > { %673 = dma.done.wait (%p476_p6), %s318_s24, 128  }
  0x71   : > { %675 = vsyncadd (%p476_p6), %s318_s24, 4294967168  ;;  %s327_s18 = scalar_lea.sflag [#allocation9], %s317_s4 }
  0x72   : > { %677 = dma.done.wait (%p476_p6), %s327_s18, 128  }
  0x73   : > { %679 = vsyncadd (%p476_p6), %s327_s18, 4294967168  ;;  %s26_s17 = sadd.s32 1, %s702_s17   ;;  %s950_s12 = smov %s686_s13 }
  0x74   : > { %p23_p7 = scmp.ge.s32.totalorder %s26_s17, 4   ;;  %s951_s13 = smov %s690_s14 }
  0x75   : > { %s952_s14 = smov %s784_s26  ;;  %s953_s15 = smov %s698_s16 }
  0x76   : > { %s954_s16 = smov %s956_s20  ;;  %25 = sbr.rel (!%p23_p7) target bundleno = 10 (0xa), region = 107 }
  0x7b   :  { %332 = vsyncpa [#allocation3], 1 }
  0x7c   :  { %334 = vsyncpa [#allocation3 + $0x1], 1 }
  0x7d   :  { %335 = vsyncpa [#allocation6], 1 }
  0x7e   :  { %337 = vsyncpa [#allocation6 + $0x1], 1 }
  0x7f   :  { %338 = vsyncpa [#allocation4], 1 }
  0x80   :  { %340 = vsyncpa [#allocation4 + $0x1], 1 }
  0x81   :  { %341 = vsyncpa [#allocation9], 1 }
  0x82   :  { %343 = vsyncpa [#allocation9 + $0x1], 1 }

</bundles_post_ra>
